<compile_context>
chip_gen: v7x
topology: tpu7x:2x2x1
jax: 0.10.0
libtpu: 0.0.40
codegen_flags: <defaults>
</compile_context>

<pallas_src>
import functools

import jax
import jax.numpy as jnp
from jax.experimental import pallas as pl
from jax.experimental.pallas import tpu as pltpu


def logreg_kernel(x_ref, w_ref, b_ref, o_ref):
    # MXU matmul (bf16 x bf16 -> f32 accumulation); bias add on VPU, sigmoid on EUP.
    x = x_ref[...].astype(w_ref.dtype)
    logits = jnp.dot(x, w_ref[...], preferred_element_type=jnp.float32)
    o_ref[...] = jax.nn.sigmoid(logits + b_ref[...]).astype(o_ref.dtype)


def _choose_fold(d_in, d_out, max_weight_bytes=4 << 20):
    """How many rows of x to pack into one lane-dense 'super row'."""
    if d_out >= 128:
        return 1
    fold = max(1, 128 // d_out)
    # Keep the (fold*D_in, fold*D_out) block-diagonal weight comfortably VMEM-resident.
    while fold > 1 and (fold * d_in) * (fold * d_out) * 2 > max_weight_bytes:
        fold //= 2
    return fold


def prepare_params(weight, bias, fold=None):
    """One-time parameter prep (outside the forward hot path).

    weight: [D_out, D_in] (PyTorch nn.Linear layout); bias: [D_out].
    Returns:
      w_packed: [fold*D_in, fold*D_out] bf16 block-diagonal weight
                (w_packed[j*D_in + k, j*D_out + m] = weight[m, k]).
      b_packed: [1, fold*D_out] f32 tiled bias.
    """
    weight = jnp.asarray(weight, jnp.float32)
    bias = jnp.asarray(bias, jnp.float32)
    d_out, d_in = weight.shape
    if fold is None:
        fold = _choose_fold(d_in, d_out)
    w_t = weight.T                                      # [D_in, D_out] — done once
    eye = jnp.eye(fold, dtype=w_t.dtype)
    w_packed = jnp.einsum("ab,km->akbm", eye, w_t)      # block diagonal
    w_packed = w_packed.reshape(fold * d_in, fold * d_out).astype(jnp.bfloat16)
    b_packed = jnp.tile(bias, fold).reshape(1, fold * d_out)
    return w_packed, b_packed


@functools.partial(jax.jit, static_argnames=("stream_budget_bytes",))
def logistic_regression_forward(x, w_packed, b_packed, *,
                                stream_budget_bytes=24 << 20):
    """x: [B, D_in]; (w_packed, b_packed) from prepare_params()."""
    B, d_in = x.shape
    k_packed, n_packed = w_packed.shape
    fold = k_packed // d_in
    d_out = n_packed // fold

    # Pad only the ragged tail group (< fold rows); the common case B % fold == 0
    # is copy-free (the reshape below preserves row-major element order).
    pad = (-B) % fold
    if pad:
        x = jnp.pad(x, ((0, pad), (0, 0)))
    Bp = B + pad
    Bg = Bp // fold
    xp = x.reshape(Bg, fold * d_in)                     # lane-dense packing, no copy

    # Tile selection: largest multiple-of-8 row tile fitting the VMEM byte budget
    # for the two double-buffered streams (x tile in, out tile back).
    in_row_bytes = fold * d_in * x.dtype.itemsize
    out_row_bytes = fold * d_out * 4                    # f32 output
    per_row_db = 2 * (in_row_bytes + out_row_bytes)     # x2 for double buffering
    tb = max(8, (stream_budget_bytes // per_row_db) // 8 * 8)
    if tb >= Bg:
        if Bg >= 16:
            half = -(-Bg // 2)                          # ceil(Bg / 2)
            tb = (half + 7) // 8 * 8                    # >=2 steps -> both v7x cores busy
        else:
            tb = Bg                                     # full-extent block (tiny batches)
    grid = (pl.cdiv(Bg, tb),)                           # Pallas clips the ragged last block

    resident_bytes = (w_packed.size * w_packed.dtype.itemsize
                      + b_packed.size * b_packed.dtype.itemsize)
    vmem_limit = int(min(48 << 20,
                         max(32 << 20, per_row_db * tb + 2 * resident_bytes + (4 << 20))))

    out = pl.pallas_call(
        logreg_kernel,
        out_shape=jax.ShapeDtypeStruct((Bg, n_packed), jnp.float32),
        grid_spec=pl.GridSpec(
            grid=grid,
            in_specs=[
                # x: streamed, double-buffered per batch tile.
                pl.BlockSpec((tb, fold * d_in), lambda i: (i, 0)),
                # W, b: constant index_map -> DMA'd once, VMEM-resident across the grid.
                pl.BlockSpec((k_packed, n_packed), lambda i: (0, 0)),
                pl.BlockSpec((1, n_packed), lambda i: (0, 0)),
            ],
            out_specs=pl.BlockSpec((tb, n_packed), lambda i: (i, 0)),
        ),
        compiler_params=pltpu.CompilerParams(
            dimension_semantics=("parallel",),          # batch tiles are independent
            vmem_limit_bytes=vmem_limit,
        ),
        cost_estimate=pl.CostEstimate(
            flops=2 * B * d_in * d_out,
            transcendentals=B * d_out,
            bytes_accessed=(B * d_in * x.dtype.itemsize
                            + k_packed * n_packed * w_packed.dtype.itemsize
                            + n_packed * 4 + B * d_out * 4),
        ),
    )(xp, w_packed, b_packed)

    out = out.reshape(Bp, d_out)                        # free un-packing
    if pad:
        out = out[:B]
    return out


if __name__ == "__main__":
    # Small shapes consistent with the module: batch=8, input_dim=32, output_dim=16.
    B, D_in, D_out = 8, 32, 16

    key = jax.random.PRNGKey(0)
    kx, kw, kb = jax.random.split(key, 3)

    x = jax.random.normal(kx, (B, D_in), dtype=jnp.float32)
    # Deterministic init mimicking nn.Linear's uniform(-1/sqrt(D_in), 1/sqrt(D_in)).
    bound = 1.0 / (D_in ** 0.5)
    weight = jax.random.uniform(kw, (D_out, D_in), jnp.float32, -bound, bound)
    bias = jax.random.uniform(kb, (D_out,), jnp.float32, -bound, bound)

    # One-time parameter prep (transpose + lane-dense block-diagonal packing +
    # bf16 cast, all hoisted out of the forward hot path).
    w_packed, b_packed = prepare_params(weight, bias)

    out = logistic_regression_forward(x, w_packed, b_packed)
    out = jax.block_until_ready(out)
    assert out.shape == (B, D_out)

    # Reference 1: exact f32 PyTorch-equivalent forward (loose tolerance: the
    # kernel's matmul inputs are bf16 by design).
    ref_f32 = jax.nn.sigmoid(x @ weight.T + bias)
    assert jnp.allclose(out, ref_f32, atol=3e-2), float(jnp.max(jnp.abs(out - ref_f32)))

    # Reference 2: same mixed precision as the kernel (bf16 operands, f32 accum).
    ref_bf16 = jax.nn.sigmoid(
        jnp.dot(x.astype(jnp.bfloat16), weight.T.astype(jnp.bfloat16),
                preferred_element_type=jnp.float32) + bias)
    assert jnp.allclose(out, ref_bf16, atol=1e-5, rtol=1e-5), \
        float(jnp.max(jnp.abs(out - ref_bf16)))

    print("KERNEL_OK")
</pallas_src>

<mosaic_0001>
module attributes {stable_mosaic.version = 11 : i64} {
  func.func @logreg_kernel(%arg0: i32, %arg1: memref<1x256xf32, #tpu.memory_space<vmem>>, %arg2: memref<256x128xbf16, #tpu.memory_space<vmem>>, %arg3: memref<1x128xf32, #tpu.memory_space<vmem>>, %arg4: memref<1x128xf32, #tpu.memory_space<vmem>>) attributes {dimension_semantics = [#tpu.dimension_semantics<parallel>], iteration_bounds = array<i64: 1>, scalar_prefetch = 0 : i64, scratch_operands = 0 : i64, tpu.core_type = #tpu.core_type<tc>, window_params = [{transform_indices = @transform_0, window_bounds = array<i64: 1, 256>}, {pipeline_mode = #tpu.pipeline_mode<synchronous>, transform_indices = @transform_1, window_bounds = array<i64: 256, 128>}, {pipeline_mode = #tpu.pipeline_mode<synchronous>, transform_indices = @transform_2, window_bounds = array<i64: 1, 128>}, {transform_indices = @transform_3, window_bounds = array<i64: 1, 128>}]} {
    %c0 = arith.constant 0 : index
    %c0_0 = arith.constant 0 : index
    %0 = vector.load %arg1[%c0, %c0_0] : memref<1x256xf32, #tpu.memory_space<vmem>>, vector<1x256xf32>
    %1 = arith.truncf %0 : vector<1x256xf32> to vector<1x256xbf16>
    %c0_1 = arith.constant 0 : index
    %c0_2 = arith.constant 0 : index
    %2 = vector.load %arg2[%c0_1, %c0_2] : memref<256x128xbf16, #tpu.memory_space<vmem>>, vector<256x128xbf16>
    %cst = arith.constant dense<0.000000e+00> : vector<1x128xf32>
    %3 = tpu.matmul %1, %2, %cst {dimension_numbers = #tpu.dot_dimension_numbers<[1], [0], [0], [1], [0, 0, 1, 1], [], []>} : vector<1x256xbf16>, vector<256x128xbf16>, vector<1x128xf32> -> vector<1x128xf32>
    %c0_3 = arith.constant 0 : index
    %c0_4 = arith.constant 0 : index
    %4 = vector.load %arg3[%c0_3, %c0_4] : memref<1x128xf32, #tpu.memory_space<vmem>>, vector<1x128xf32>
    %5 = arith.addf %3, %4 : vector<1x128xf32>
    %6 = arith.negf %5 : vector<1x128xf32>
    %7 = math.exp %6 : vector<1x128xf32>
    %cst_5 = arith.constant 1.000000e+00 : f32
    %8 = vector.broadcast %cst_5 : f32 to vector<1x128xf32>
    %9 = arith.addf %8, %7 : vector<1x128xf32>
    %10 = arith.divf %8, %9 : vector<1x128xf32>
    %c0_6 = arith.constant 0 : index
    %c0_7 = arith.constant 0 : index
    %11 = vector.load %arg4[%c0_6, %c0_7] : memref<1x128xf32, #tpu.memory_space<vmem>>, vector<1x128xf32>
    tpu.vector_store %arg4[%c0_6, %c0_7], %10 {strides = array<i32>} : memref<1x128xf32, #tpu.memory_space<vmem>>, vector<1x128xf32>,
    return
  }
  func.func @transform_0(%arg0: i32) -> (i32, i32) {
    %c0_i32 = arith.constant 0 : i32
    %c0_i32_0 = arith.constant 0 : i32
    return %arg0, %c0_i32 : i32, i32
  }
  func.func @transform_1(%arg0: i32) -> (i32, i32) {
    %c0_i32 = arith.constant 0 : i32
    %c0_i32_0 = arith.constant 0 : i32
    %c0_i32_1 = arith.constant 0 : i32
    return %c0_i32, %c0_i32_0 : i32, i32
  }
  func.func @transform_2(%arg0: i32) -> (i32, i32) {
    %c0_i32 = arith.constant 0 : i32
    %c0_i32_0 = arith.constant 0 : i32
    %c0_i32_1 = arith.constant 0 : i32
    return %c0_i32, %c0_i32_0 : i32, i32
  }
  func.func @transform_3(%arg0: i32) -> (i32, i32) {
    %c0_i32 = arith.constant 0 : i32
    %c0_i32_0 = arith.constant 0 : i32
    return %arg0, %c0_i32 : i32, i32
  }
}

</mosaic_0001>

<bundles_post_ra>
// kernel: logistic_regression_forward.1
= control target key start
LH: loop header
LB: loop body
LE: loop exit
PB: predicated region body
PF: predicated region fallthrough
CT: control target
= control target key end

     0   :  { %8 = vsyncpa [#allocation3], 0  ;;  %s310_s12 = smov [#allocation2]   ;;  %s354_s0 = inlined_call_operand.vmem [shape: f32[1,256], index: 0, kind: input, shape index: {}]   ;;  %s355_s1 = inlined_call_operand.hbm [shape: bf16[256,128], index: 1, kind: input, shape index: {}]   ;;  %s356_s2 = inlined_call_operand.vmem [shape: f32[1,128], index: 2, kind: input, shape index: {}]   ;;  %s357_s3 = inlined_call_operand.vmem [shape: f32[1,128], index: 3, kind: output, shape index: {}]  }
   0x1   :  { %s16_s13 = sshll.u32 %s310_s12, 4  ;;  %s286_s16 = scalar_lea.hbm %s355_s1, 2048  ;;  %s17_s13 = int_to_ptr.vmem [resolvable:$true] %s16_s13 }
   0x2   :  { %p287_p0 = scmp.ne.s32.totalorder %s355_s1, %s286_s16  ;;  %p290_p1 = scmp.lt.u32.totalorder %s286_s16, %s355_s1 }
   0x4   :  { %p292_p2 = pnand %p290_p1, %p287_p0 }
   0x6   :  { %295 = shalt.err (!%p292_p2)
}
   0x7   :  { %s296_s21 = scalar_lea.vmem %s17_s13, 2048  ;;  %p301_p4 = scmp.lt.s32.totalorder %s17_s13, %s17_s13 }
   0x8   :  { %p297_p3 = scmp.ne.s32.totalorder %s17_s13, %s296_s21  ;;  %p302_p5 = scmp.lt.s32.totalorder %s296_s21, %s296_s21 }
   0xa   :  { %p303_p6 = por %p302_p5, %p301_p4 }
   0xc   :  { %p304_p7 = pnand %p303_p6, %p297_p3 }
   0xe   :  { %307 = shalt.err (!%p304_p7)
}
   0xf   :  { %s311_s22 = smov 64   ;;  %s312_s23 = smov 4  }
  0x10   :  { %22 = dma.hbm_to_vmem [thread:$0]  %s355_s1, 2048, %s17_s13, [#allocation3], %s311_s22, %s311_s22, %s312_s23  }
  0x11   :  { %308 = dma.done.wait [#allocation3], 2048  }
  0x12   :  { %309 = vsyncadd [#allocation3], 4294965248  ;;  %v266_v0 = vld [vmem:[#allocation2 + $0x40] sm:$0xff]   ;;  %v268_v2 = vld [vmem:[#allocation2 + $0x48] sm:$0xff]   ;;  %v31_v5 = vlaneseq }
  0x13   :  { %v267_v1 = vld [vmem:[#allocation2] sm:$0xff]   ;;  %241 = vmatprep.subr.bf16.mxu0 %v266_v0  ;;  %v269_v3 = vld [vmem:[#allocation2 + $0x8] sm:$0xff]   ;;  %v270_v4 = vld [vmem:[#allocation2 + $0x50] sm:$0xff]  }
  0x14   :  { %242 = vmatpush3.bf16.msra.mxu0 %v267_v1  ;;  %v271_v6 = vld [vmem:[#allocation2 + $0x10] sm:$0xff]   ;;  %v272_v7 = vld [vmem:[#allocation2 + $0x58] sm:$0xff]   ;;  %v32_v8 = vshrl.u32 %v31_v5, 7  ;;  %v274_v10 = vld [vmem:[#allocation2 + $0x60] sm:$0xff]  }
  0x15   :  { %243 = vmatprep.subr.bf16.mxu0 %v268_v2  ;;  %v273_v9 = vld [vmem:[#allocation2 + $0x18] sm:$0xff]   ;;  %v275_v12 = vld [vmem:[#allocation2 + $0x20] sm:$0xff]   ;;  %v276_v13 = vld [vmem:[#allocation2 + $0x68] sm:$0xff]  }
  0x16   :  { %v37_v11 = vsub.s32 1, %v32_v8  ;;  %v29_v14 = vld [vmem:[%s354_s0] sm:$0x3]  ;;  %v277_v16 = vld [vmem:[#allocation2 + $0x28] sm:$0xff]   ;;  %v278_v18 = vld [vmem:[#allocation2 + $0x70] sm:$0xff]   ;;  %v33_v19 = vsub.s32 0, %v32_v8 }
  0x17   :  { %v279_v20 = vld [vmem:[#allocation2 + $0x30] sm:$0xff]   ;;  %v280_v21 = vld [vmem:[#allocation2 + $0x78] sm:$0xff]   ;;  %v75_v26 = vld [vmem:[%s356_s2] sm:$0x1] }
  0x18   :  { %244 = vmatpush3.bf16.msra.mxu0 %v269_v3  ;;  %v38_v15 = vrot.slane %v29_v14, %v37_v11  ;;  %v34_v22 = vrot.slane %v29_v14, %v33_v19  ;;  %v281_v23 = vld [vmem:[#allocation2 + $0x38] sm:$0xff]  }
  0x19   :  { %245 = vmatprep.subr.bf16.mxu0 %v270_v4 }
  0x1a   :  { %v42_v17 = vpack.c.bf16 %v38_v15, %v38_v15  ;;  %v41_v24 = vpack.c.bf16 %v34_v22, %v34_v22 }
  0x1c   :  { %246 = vmatpush3.bf16.msra.mxu0 %v271_v6  ;;  %204 = vmatprep.mubr.bf16.mxu0 %v42_v17 }
  0x1d   :  { %247 = vmatprep.subr.bf16.mxu0 %v272_v7 }
  0x20   :  { %248 = vmatpush3.bf16.msra.mxu0 %v273_v9 }
  0x21   :  { %249 = vmatprep.subr.bf16.mxu0 %v274_v10 }
  0x24   :  { %250 = vmatpush3.bf16.msra.mxu0 %v275_v12 }
  0x25   :  { %251 = vmatprep.subr.bf16.mxu0 %v276_v13 }
  0x28   :  { %252 = vmatpush3.bf16.msra.mxu0 %v277_v16 }
  0x29   :  { %253 = vmatprep.subr.bf16.mxu0 %v278_v18 }
  0x2c   :  { %254 = vmatpush3.bf16.msra.mxu0 %v279_v20 }
  0x2d   :  { %255 = vmatprep.subr.bf16.mxu0 %v280_v21 }
  0x30   :  { %256 = vmatpush3.bf16.msra.mxu0 %v281_v23 }
  0x33   :  { %205 = vmatmul.mubr.bf16.vlgmr.msra.gmra.mrb[0].mxu0 %v41_v24 }
 0x106   :  { %v257_v25 = vpop.f32.mrb[0].mxu0 }
 0x107   :  { %v258_v27 = vpop.f32.mrb[1].mxu0 }
 0x108   :  { %v259_v28 = vadd.f32 %v258_v27, %v257_v25  ;;  %v260_v29 = vpop.f32.mrb[2].mxu0 }
 0x109   :  { %v261_v30 = vpop.f32.mrb[3].mxu0 }
 0x10a   :  { %v207_v31 = vadd.f32 %v259_v28, %v75_v26 }
 0x10c   :  { %v240_v32 = vmul.f32 -1.442695, %v207_v31 }
 0x10e   :  { %282 = vpow2.f32 %v240_v32 }
 0x118   :  { %v283_v33 = vpop.eup %282 }
 0x119   :  { %v215_v34 = vadd.f32 1.0, %v283_v33 }
 0x11b   :  { %284 = vrcp.f32 %v215_v34 }
 0x125   :  { %v285_v35 = vpop.eup %284 }
 0x126   :  { %218 = vst [vmem:[%s357_s3] sm:$0x1] %v285_v35 }
 0x127   :  { %223 = vsyncpa [#allocation3], 1 }

</bundles_post_ra>
